<compile_context>
chip_gen: v7x
topology: tpu7x:2x2x1
jax: 0.10.0
libtpu: 0.0.40
codegen_flags: <defaults>
</compile_context>

<pallas_src>
import jax
import jax.numpy as jnp
from jax.experimental import pallas as pl
from jax.experimental.pallas import tpu as pltpu

# Layer sizes of NN2_Stage2: 8 -> 64 -> 32 -> 1.
D_IN, D_H1, D_H2, D_OUT = 8, 64, 32, 1
_LANE = 128


def _mlp_kernel(xt_ref, w1_ref, b1_ref, w2_ref, b2_ref, w3_ref, b3_ref, o_ref):
    """Fused feature-major MLP; one batch tile (TB lanes) per grid step.

    xt_ref: (8, TB)  bf16    w1_ref: (64, 8) bf16   w2_ref: (32, 64) bf16
    w3_ref: (32, 1)  f32     b*_ref: (D, 1)  f32    o_ref:  (1, TB)  f32
    """
    x = xt_ref[...]                                                    # (8, TB) bf16

    # fc1 + ReLU: bf16 MXU matmul, f32 accumulate; bias/activation kept f32 (v5e VPU).
    h1 = jnp.dot(w1_ref[...], x, preferred_element_type=jnp.float32) + b1_ref[...]
    h1 = jnp.maximum(h1, 0.0)                                          # (64, TB) f32
    # dropout -> identity (eval mode)

    # fc2 + ReLU.
    h2 = jnp.dot(w2_ref[...], h1.astype(jnp.bfloat16),
                 preferred_element_type=jnp.float32) + b2_ref[...]
    h2 = jnp.maximum(h2, 0.0)                                          # (32, TB) f32
    # dropout -> identity (eval mode)

    # fc3: out_features == 1, so skip the M=1 MXU pass -- VPU multiply + sublane
    # reduce (XLU slot is otherwise idle here).
    logits = jnp.sum(h2 * w3_ref[...], axis=0, keepdims=True) + b3_ref[...]
    o_ref[...] = jax.nn.sigmoid(logits)                                # (1, TB), lane-dense


def nn2_stage2_forward(x, params, *, tb=16384):
    """x: (N, 8) float32 (PyTorch layout).  params: w{1,2,3} as (out, in), b{1,2,3} as (out, 1).

    Returns (N, 1) float32 = sigmoid(fc3(relu(fc2(relu(fc1(x)))))).
    """
    n, d_in = x.shape
    assert d_in == D_IN

    # Batch tile: multiple of 128 lanes, large enough to amortize the ~0.35 us
    # per-grid-step overhead; if the whole batch fits in a single tile but is
    # bigger than one vreg row, split into ~2 even tiles so v7x's two TensorCores
    # both get work on the "parallel" axis.
    n_lane = int(pl.cdiv(n, _LANE)) * _LANE
    tb_eff = max((min(tb, n_lane) // _LANE) * _LANE, _LANE)
    if n_lane > _LANE and n_lane <= tb_eff:
        tb_eff = int(pl.cdiv(n_lane, 2 * _LANE)) * _LANE
    n_pad = int(pl.cdiv(n, tb_eff)) * tb_eff
    grid = (n_pad // tb_eff,)

    # Feature-major, lane-dense, bf16 input slab (transpose + cast + zero-pad of the
    # ragged tail).  allow_input_fusion=[0] below lets XLA fuse this producer into
    # the pallas call rather than spending an extra HBM pass on it.
    xt = jnp.pad(x.T.astype(jnp.bfloat16), ((0, 0), (0, n_pad - n)))

    w1 = params["w1"].astype(jnp.bfloat16)                        # (64, 8)
    w2 = params["w2"].astype(jnp.bfloat16)                        # (32, 64)
    w3 = params["w3"].reshape(D_H2, D_OUT).astype(jnp.float32)    # (32, 1) column for VPU fc3
    b1, b2, b3 = params["b1"], params["b2"], params["b3"]         # (D, 1) f32

    # Per-step VMEM footprint: double-buffered x/out tiles + f32 intermediates + params.
    step_bytes = tb_eff * (2 * 2 * D_IN           # x tile, bf16, 2 buffers
                           + 4 * (D_H1 + D_H2)    # h1/h2 f32 intermediates
                           + 2 * 4 * D_OUT)       # out tile, f32, 2 buffers
    step_bytes += 64 * 1024                       # weights/biases + slack
    vmem_limit = int(min(32 * 1024 * 1024, max(16 * 1024 * 1024, 2 * step_bytes)))

    n_weight_bytes = (2 * (D_IN * D_H1 + D_H1 * D_H2)
                      + 4 * (D_H2 * D_OUT + D_H1 + D_H2 + D_OUT))
    cost = pl.CostEstimate(
        flops=2 * n_pad * (D_IN * D_H1 + D_H1 * D_H2 + D_H2 * D_OUT),
        transcendentals=2 * n_pad,                                # sigmoid: exp + recip per row
        bytes_accessed=2 * n_pad * D_IN + 4 * n_pad * D_OUT + n_weight_bytes,
    )

    const = lambda shape: pl.BlockSpec(shape, lambda i: (0, 0))   # VMEM-resident params

    out_t = pl.pallas_call(
        _mlp_kernel,
        out_shape=jax.ShapeDtypeStruct((D_OUT, n_pad), jnp.float32),
        grid_spec=pltpu.PrefetchScalarGridSpec(
            num_scalar_prefetch=0,
            grid=grid,
            in_specs=[
                pl.BlockSpec((D_IN, tb_eff), lambda i: (0, i)),   # x tile (8, TB) bf16
                const((D_H1, D_IN)), const((D_H1, 1)),            # fc1
                const((D_H2, D_H1)), const((D_H2, 1)),            # fc2
                const((D_H2, D_OUT)), const((D_OUT, 1)),          # fc3 (column weight)
            ],
            out_specs=pl.BlockSpec((D_OUT, tb_eff), lambda i: (0, i)),
        ),
        compiler_params=pltpu.CompilerParams(
            dimension_semantics=("parallel",),        # batch axis shards across TCs (v7x)
            vmem_limit_bytes=vmem_limit,
            allow_input_fusion=[0],                   # fuse transpose/cast/pad of xt
        ),
        cost_estimate=cost,
    )(xt, w1, b1, w2, b2, w3, b3)

    return out_t[:, :n].T                                          # (N, 1)


def init_params(key):
    """Deterministic init mimicking PyTorch Linear default (uniform +/- 1/sqrt(fan_in)).

    Weights stored exactly like PyTorch: (out_features, in_features); biases as (out, 1).
    """
    ks = jax.random.split(key, 6)

    def linear(kw, kb, fan_in, fan_out):
        bound = 1.0 / jnp.sqrt(fan_in)
        w = jax.random.uniform(kw, (fan_out, fan_in), jnp.float32, -bound, bound)
        b = jax.random.uniform(kb, (fan_out, 1), jnp.float32, -bound, bound)
        return w, b

    w1, b1 = linear(ks[0], ks[1], D_IN, D_H1)
    w2, b2 = linear(ks[2], ks[3], D_H1, D_H2)
    w3, b3 = linear(ks[4], ks[5], D_H2, D_OUT)
    return {"w1": w1, "b1": b1, "w2": w2, "b2": b2, "w3": w3, "b3": b3}


def _reference(x, p):
    """Pure f32 reference of the PyTorch forward (eval mode)."""
    h1 = jnp.maximum(x @ p["w1"].T + p["b1"][:, 0], 0.0)
    h2 = jnp.maximum(h1 @ p["w2"].T + p["b2"][:, 0], 0.0)
    return jax.nn.sigmoid(h2 @ p["w3"].T + p["b3"][:, 0])


if __name__ == "__main__":
    key = jax.random.PRNGKey(0)
    k_x, k_x2, k_p = jax.random.split(key, 3)
    params = init_params(k_p)

    # Tolerances loosened vs. the pure-f32 reference because fc1/fc2 run on the MXU
    # with bf16 operands (small K keeps the error well below 1e-2 at the sigmoid output).
    ATOL = RTOL = 1e-2

    # Small demo batch (single 128-lane tile, auto-padded).
    N = 16
    x = jax.random.normal(k_x, (N, D_IN), jnp.float32)
    out = jax.block_until_ready(nn2_stage2_forward(x, params))
    ref = _reference(x, params)
    assert out.shape == (N, 1)
    assert jnp.allclose(out, ref, atol=ATOL, rtol=RTOL)

    # Ragged multi-tile path (exercises padding + multi-step parallel grid).
    N2 = 300
    x2 = jax.random.normal(k_x2, (N2, D_IN), jnp.float32)
    out2 = jax.block_until_ready(nn2_stage2_forward(x2, params, tb=128))
    ref2 = _reference(x2, params)
    assert out2.shape == (N2, 1)
    assert jnp.allclose(out2, ref2, atol=ATOL, rtol=RTOL)

    # Default (large-tile) path on the same ragged batch: tb_eff auto-caps so the
    # grid still has 2 steps (v7x megacore-friendly).
    out3 = jax.block_until_ready(nn2_stage2_forward(x2, params))
    assert out3.shape == (N2, 1)
    assert jnp.allclose(out3, ref2, atol=ATOL, rtol=RTOL)

    print("KERNEL_OK")
</pallas_src>

<mosaic_0001>
module attributes {stable_mosaic.version = 11 : i64} {
  func.func @_mlp_kernel(%arg0: i32, %arg1: memref<8x128xbf16, #tpu.memory_space<vmem>>, %arg2: memref<64x8xbf16, #tpu.memory_space<vmem>>, %arg3: memref<64x1xf32, #tpu.memory_space<vmem>>, %arg4: memref<32x64xbf16, #tpu.memory_space<vmem>>, %arg5: memref<32x1xf32, #tpu.memory_space<vmem>>, %arg6: memref<32x1xf32, #tpu.memory_space<vmem>>, %arg7: memref<1x1xf32, #tpu.memory_space<vmem>>, %arg8: memref<1x128xf32, #tpu.memory_space<vmem>>) attributes {dimension_semantics = [#tpu.dimension_semantics<parallel>], iteration_bounds = array<i64: 1>, scalar_prefetch = 0 : i64, scratch_operands = 0 : i64, tpu.core_type = #tpu.core_type<tc>, window_params = [{transform_indices = @transform_0, window_bounds = array<i64: 8, 128>}, {pipeline_mode = #tpu.pipeline_mode<synchronous>, transform_indices = @transform_1, window_bounds = array<i64: 64, 8>}, {pipeline_mode = #tpu.pipeline_mode<synchronous>, transform_indices = @transform_2, window_bounds = array<i64: 64, 1>}, {pipeline_mode = #tpu.pipeline_mode<synchronous>, transform_indices = @transform_3, window_bounds = array<i64: 32, 64>}, {pipeline_mode = #tpu.pipeline_mode<synchronous>, transform_indices = @transform_4, window_bounds = array<i64: 32, 1>}, {pipeline_mode = #tpu.pipeline_mode<synchronous>, transform_indices = @transform_5, window_bounds = array<i64: 32, 1>}, {pipeline_mode = #tpu.pipeline_mode<synchronous>, transform_indices = @transform_6, window_bounds = array<i64: 1, 1>}, {transform_indices = @transform_7, window_bounds = array<i64: 1, 128>}]} {
    %c0 = arith.constant 0 : index
    %c0_0 = arith.constant 0 : index
    %0 = vector.load %arg1[%c0, %c0_0] : memref<8x128xbf16, #tpu.memory_space<vmem>>, vector<8x128xbf16>
    %c0_1 = arith.constant 0 : index
    %c0_2 = arith.constant 0 : index
    %1 = vector.load %arg2[%c0_1, %c0_2] : memref<64x8xbf16, #tpu.memory_space<vmem>>, vector<64x8xbf16>
    %cst = arith.constant dense<0.000000e+00> : vector<64x128xf32>
    %2 = tpu.matmul %1, %0, %cst {dimension_numbers = #tpu.dot_dimension_numbers<[1], [0], [0], [1], [0, 0, 1, 1], [], []>} : vector<64x8xbf16>, vector<8x128xbf16>, vector<64x128xf32> -> vector<64x128xf32>
    %c0_3 = arith.constant 0 : index
    %c0_4 = arith.constant 0 : index
    %3 = vector.load %arg3[%c0_3, %c0_4] : memref<64x1xf32, #tpu.memory_space<vmem>>, vector<64x1xf32>
    %4 = vector.broadcast %3 : vector<64x1xf32> to vector<64x128xf32>
    %5 = arith.addf %2, %4 : vector<64x128xf32>
    %cst_5 = arith.constant 0.000000e+00 : f32
    %6 = vector.broadcast %cst_5 : f32 to vector<64x128xf32>
    %7 = arith.maximumf %5, %6 : vector<64x128xf32>
    %c0_6 = arith.constant 0 : index
    %c0_7 = arith.constant 0 : index
    %8 = vector.load %arg4[%c0_6, %c0_7] : memref<32x64xbf16, #tpu.memory_space<vmem>>, vector<32x64xbf16>
    %9 = arith.truncf %7 : vector<64x128xf32> to vector<64x128xbf16>
    %cst_8 = arith.constant dense<0.000000e+00> : vector<32x128xf32>
    %10 = tpu.matmul %8, %9, %cst_8 {dimension_numbers = #tpu.dot_dimension_numbers<[1], [0], [0], [1], [0, 0, 1, 1], [], []>} : vector<32x64xbf16>, vector<64x128xbf16>, vector<32x128xf32> -> vector<32x128xf32>
    %c0_9 = arith.constant 0 : index
    %c0_10 = arith.constant 0 : index
    %11 = vector.load %arg5[%c0_9, %c0_10] : memref<32x1xf32, #tpu.memory_space<vmem>>, vector<32x1xf32>
    %12 = vector.broadcast %11 : vector<32x1xf32> to vector<32x128xf32>
    %13 = arith.addf %10, %12 : vector<32x128xf32>
    %cst_11 = arith.constant 0.000000e+00 : f32
    %14 = vector.broadcast %cst_11 : f32 to vector<32x128xf32>
    %15 = arith.maximumf %13, %14 : vector<32x128xf32>
    %c0_12 = arith.constant 0 : index
    %c0_13 = arith.constant 0 : index
    %16 = vector.load %arg6[%c0_12, %c0_13] : memref<32x1xf32, #tpu.memory_space<vmem>>, vector<32x1xf32>
    %17 = vector.broadcast %16 : vector<32x1xf32> to vector<32x128xf32>
    %18 = arith.mulf %15, %17 : vector<32x128xf32>
    %cst_14 = arith.constant dense<0.000000e+00> : vector<128xf32>
    %19 = vector.multi_reduction <add>, %18, %cst_14 [0] : vector<32x128xf32> to vector<128xf32>
    %20 = vector.shape_cast %19 : vector<128xf32> to vector<1x128xf32>
    %c0_15 = arith.constant 0 : index
    %c0_16 = arith.constant 0 : index
    %21 = vector.load %arg7[%c0_15, %c0_16] : memref<1x1xf32, #tpu.memory_space<vmem>>, vector<1x1xf32>
    %22 = vector.broadcast %21 : vector<1x1xf32> to vector<1x128xf32>
    %23 = arith.addf %20, %22 : vector<1x128xf32>
    %24 = arith.negf %23 : vector<1x128xf32>
    %25 = math.exp %24 : vector<1x128xf32>
    %cst_17 = arith.constant 1.000000e+00 : f32
    %26 = vector.broadcast %cst_17 : f32 to vector<1x128xf32>
    %27 = arith.addf %26, %25 : vector<1x128xf32>
    %28 = arith.divf %26, %27 : vector<1x128xf32>
    %c0_18 = arith.constant 0 : index
    %c0_19 = arith.constant 0 : index
    %29 = vector.load %arg8[%c0_18, %c0_19] : memref<1x128xf32, #tpu.memory_space<vmem>>, vector<1x128xf32>
    tpu.vector_store %arg8[%c0_18, %c0_19], %28 {strides = array<i32>} : memref<1x128xf32, #tpu.memory_space<vmem>>, vector<1x128xf32>,
    return
  }
  func.func @transform_0(%arg0: i32) -> (i32, i32) {
    %c0_i32 = arith.constant 0 : i32
    %c0_i32_0 = arith.constant 0 : i32
    return %c0_i32, %arg0 : i32, i32
  }
  func.func @transform_1(%arg0: i32) -> (i32, i32) {
    %c0_i32 = arith.constant 0 : i32
    %c0_i32_0 = arith.constant 0 : i32
    %c0_i32_1 = arith.constant 0 : i32
    return %c0_i32, %c0_i32_0 : i32, i32
  }
  func.func @transform_2(%arg0: i32) -> (i32, i32) {
    %c0_i32 = arith.constant 0 : i32
    %c0_i32_0 = arith.constant 0 : i32
    %c0_i32_1 = arith.constant 0 : i32
    return %c0_i32, %c0_i32_0 : i32, i32
  }
  func.func @transform_3(%arg0: i32) -> (i32, i32) {
    %c0_i32 = arith.constant 0 : i32
    %c0_i32_0 = arith.constant 0 : i32
    %c0_i32_1 = arith.constant 0 : i32
    return %c0_i32, %c0_i32_0 : i32, i32
  }
  func.func @transform_4(%arg0: i32) -> (i32, i32) {
    %c0_i32 = arith.constant 0 : i32
    %c0_i32_0 = arith.constant 0 : i32
    %c0_i32_1 = arith.constant 0 : i32
    return %c0_i32, %c0_i32_0 : i32, i32
  }
  func.func @transform_5(%arg0: i32) -> (i32, i32) {
    %c0_i32 = arith.constant 0 : i32
    %c0_i32_0 = arith.constant 0 : i32
    %c0_i32_1 = arith.constant 0 : i32
    return %c0_i32, %c0_i32_0 : i32, i32
  }
  func.func @transform_6(%arg0: i32) -> (i32, i32) {
    %c0_i32 = arith.constant 0 : i32
    %c0_i32_0 = arith.constant 0 : i32
    %c0_i32_1 = arith.constant 0 : i32
    return %c0_i32, %c0_i32_0 : i32, i32
  }
  func.func @transform_7(%arg0: i32) -> (i32, i32) {
    %c0_i32 = arith.constant 0 : i32
    %c0_i32_0 = arith.constant 0 : i32
    return %c0_i32, %arg0 : i32, i32
  }
}

</mosaic_0001>

<bundles_post_ra>
// kernel: tpu_custom_call.1
= control target key start
LH: loop header
LB: loop body
LE: loop exit
PB: predicated region body
PF: predicated region fallthrough
CT: control target
= control target key end

     0   :  { %s585_s0 = inlined_call_operand.vmem [shape: bf16[8,128], index: 0, kind: input, shape index: {}]   ;;  %s586_s1 = inlined_call_operand.vmem [shape: bf16[64,8], index: 1, kind: input, shape index: {}]   ;;  %s587_s2 = inlined_call_operand.vmem [shape: f32[64,1], index: 2, kind: input, shape index: {}]   ;;  %s588_s3 = inlined_call_operand.vmem [shape: bf16[32,64], index: 3, kind: input, shape index: {}]   ;;  %s589_s4 = inlined_call_operand.vmem [shape: f32[32,1], index: 4, kind: input, shape index: {}]   ;;  %s590_s5 = inlined_call_operand.vmem [shape: f32[32,1], index: 5, kind: input, shape index: {}]   ;;  %s591_s6 = inlined_call_operand.<no memory space> [shape: f32[1,1], index: 6, kind: input, shape index: {}]   ;;  %s592_s7 = inlined_call_operand.hbm [shape: f32[1,128], index: 7, kind: output, shape index: {}]  }
   0x1   :  { %v12_v0 = vstv %s591_s6 }
   0x2   :  { %13 = vst [vmem:[#allocation2] sm:$0x1] %v12_v0 }
   0x3   :  { %v30_v1 = vld [vmem:[%s585_s0] sm:$0xf]  ;;  %vm120_vm0 = vcmask 1043456   ;;  %vm107_vm1 = vcmask 64512   ;;  %v420_v4 = vld [vmem:[%s586_s1 + $0x8] sm:$0xff]   ;;  %v421_v5 = vld [vmem:[%s586_s1 + $0x10] sm:$0xff]  }
   0x4   :  { %v419_v2 = vld [vmem:[%s586_s1] sm:$0xff]   ;;  %414 = vmatprep.subr.msk.bf16.mxu0 %vm120_vm0, %v30_v1  ;;  %v122_v3 = vsel %vm120_vm0, %v30_v1, 0  ;;  %v453_v6 = vmov 0   ;;  %v41_v8 = vld [vmem:[%s587_s2 + $0x10] sm:$0xff]  ;;  %v40_v9 = vld [vmem:[%s587_s2 + $0x8] sm:$0xff] }
   0x5   :  { %393 = vmatpush3.bf16.msra.mxu0 %v122_v3  ;;  %394 = vmatprep.mubr.msk.bf16.mxu0 %vm107_vm1, %v419_v2  ;;  %v39_v7 = vld [vmem:[%s587_s2] sm:$0xff]  ;;  %v42_v10 = vld [vmem:[%s587_s2 + $0x18] sm:$0xff]  ;;  %v44_v13 = vld [vmem:[%s587_s2 + $0x28] sm:$0xff] }
   0x6   :  { %417 = vset.pattern.permute.xlu0 %v453_v6  ;;  %418 = vset.pattern.permute.xlu1 %v453_v6  ;;  %v422_v11 = vld [vmem:[%s586_s1 + $0x18] sm:$0xff]   ;;  %v43_v12 = vld [vmem:[%s587_s2 + $0x20] sm:$0xff] }
   0x7   :  { %49 = vperm.xlu0 %417, %v39_v7   ;;  %59 = vperm.xlu1 %418, %v41_v8  }
   0x8   :  { %395 = vmatmul.mubr.msk.bf16.vlgmr.msra.gmra.mrb[0].mxu0 %vm107_vm1, %v420_v4 }
   0x9   :  { %398 = vmatprep.mubr.msk.bf16.mxu0 %vm107_vm1, %v421_v5 }
   0xb   :  { %54 = vperm.xlu0 %417, %v40_v9   ;;  %64 = vperm.xlu1 %418, %v42_v10  }
   0xc   :  { %14 = vsyncpa [#allocation4], 0  ;;  %v45_v14 = vld [vmem:[%s587_s2 + $0x30] sm:$0xff]  ;;  %v46_v15 = vld [vmem:[%s587_s2 + $0x38] sm:$0xff]  ;;  %vm239_vm2 = vcmask 523264  }
   0xd   :  { %v205_v16 = vld [vmem:[%s589_s4] sm:$0xff]  ;;  %v206_v17 = vld [vmem:[%s589_s4 + $0x8] sm:$0xff]  ;;  %v207_v18 = vld [vmem:[%s589_s4 + $0x10] sm:$0xff] }
   0xe   :  { %v208_v19 = vld [vmem:[%s589_s4 + $0x18] sm:$0xff]  ;;  %v299_v20 = vld [vmem:[%s590_s5] sm:$0xff]  ;;  %v300_v21 = vld [vmem:[%s590_s5 + $0x8] sm:$0xff] }
   0xf   :  { %69 = vperm.xlu0 %417, %v43_v12   ;;  %74 = vperm.xlu1 %418, %v44_v13   ;;  %v301_v22 = vld [vmem:[%s590_s5 + $0x10] sm:$0xff]  ;;  %v302_v23 = vld [vmem:[%s590_s5 + $0x18] sm:$0xff]  ;;  %v336_v24 = vld [vmem:[#allocation2] sm:$0x1] }
  0x10   :  { %399 = vmatmul.mubr.msk.bf16.gmra.mrb[4].mxu0 %vm107_vm1, %v422_v11  ;;  %v423_v25 = vld [vmem:[%s588_s3] sm:$0xff]   ;;  %v424_v62 = vld [vmem:[%s588_s3 + $0x8] sm:$0xff]   ;;  %s454_s3 = smov [#allocation3]  }
  0x11   :  { %410 = vmatprep.mubr.msk.bf16.mxu1 %vm239_vm2, %v423_v25  ;;  %v342_v25 = vlaneseq  ;;  %s360_s18 = sshll.u32 %s454_s3, 4  ;;  %s361_s18 = int_to_ptr.vmem [resolvable:$true] %s360_s18 }
  0x12   :  { %s429_s19 = scalar_lea.vmem %s361_s18, 16  ;;  %s433_s20 = scalar_lea.vmem %s361_s18, 32 }
  0x13   :  { %79 = vperm.xlu0 %417, %v45_v14   ;;  %84 = vperm.xlu1 %418, %v46_v15   ;;  %p430_p0 = scmp.ne.s32.totalorder %s361_s18, %s429_s19  ;;  %p434_p1 = scmp.lt.s32.totalorder %s361_s18, %s361_s18 }
  0x14   :  { %p435_p2 = scmp.lt.s32.totalorder %s433_s20, %s429_s19 }
  0x16   :  { %p436_p3 = por %p435_p2, %p434_p1 }
  0x17   :  { %211 = vperm.xlu0 %417, %v205_v16   ;;  %216 = vperm.xlu1 %418, %v206_v17  }
  0x18   :  { %p437_p4 = pnand %p436_p3, %p430_p0 }
  0x1b   :  { %221 = vperm.xlu0 %417, %v207_v18   ;;  %226 = vperm.xlu1 %418, %v208_v19  }
  0x1f   :  { %305 = vperm.xlu0 %417, %v299_v20   ;;  %310 = vperm.xlu1 %418, %v300_v21  }
  0x23   :  { %315 = vperm.xlu0 %417, %v301_v22   ;;  %320 = vperm.xlu1 %418, %v302_v23  }
  0x27   :  { %339 = vperm.xlu0 %417, %v336_v24  }
  0x86   :  { %v50_v26 = vpop.permute.xlu0 %49  ;;  %v60_v27 = vpop.permute.xlu1 %59 }
  0x8a   :  { %v55_v28 = vpop.permute.xlu0 %54  ;;  %v65_v29 = vpop.permute.xlu1 %64 }
  0x8e   :  { %v70_v33 = vpop.permute.xlu0 %69  ;;  %v75_v38 = vpop.permute.xlu1 %74 }
  0x92   :  { %v80_v45 = vpop.permute.xlu0 %79  ;;  %v85_v50 = vpop.permute.xlu1 %84 }
  0x96   :  { %v212_v63 = vpop.permute.xlu0 %211  ;;  %v217_v0 = vpop.permute.xlu1 %216 }
  0x9a   :  { %v222_v1 = vpop.permute.xlu0 %221  ;;  %v227_v2 = vpop.permute.xlu1 %226 }
  0x9e   :  { %v306_v8 = vpop.permute.xlu0 %305  ;;  %v311_v13 = vpop.permute.xlu1 %310 }
  0xa2   :  { %v316_v19 = vpop.permute.xlu0 %315  ;;  %v321_v22 = vpop.permute.xlu1 %320 }
  0xdb   :  { %v396_v30 = vpop.f32.mrb[0].mxu0 }
  0xdc   :  { %v167_v31 = vadd.f32 %v396_v30, %v60_v27  ;;  %v158_v32 = vpop.f32.mrb[1].mxu0 }
  0xdd   :  { %v159_v34 = vadd.f32 %v158_v32, %v50_v26  ;;  %v397_v35 = vpop.f32.mrb[2].mxu0 }
  0xde   :  { %v170_v36 = vadd.f32 %v397_v35, %v65_v29  ;;  %v161_v37 = vpop.f32.mrb[3].mxu0  ;;  %v191_v40 = vmax.f32 %v167_v31, 0.0 }
  0xdf   :  { %v162_v39 = vadd.f32 %v161_v37, %v55_v28  ;;  %v189_v42 = vmax.f32 %v159_v34, 0.0  ;;  %v343_v28 = vshrl.u32 %v342_v25, 7 }
  0xe0   :  { %v192_v41 = vmax.f32 %v170_v36, 0.0 }
  0xe1   :  { %v190_v43 = vmax.f32 %v162_v39, 0.0  ;;  %v344_v31 = vsub.s32 0, %v343_v28 }
  0xe2   :  { %v202_v44 = vpack.c.bf16 %v192_v41, %v191_v40 }
  0xe3   :  { %v400_v46 = vpop.f32.mrb[4].mxu0  ;;  %v201_v47 = vpack.c.bf16 %v190_v43, %v189_v42 }
  0xe4   :  { %v183_v48 = vadd.f32 %v400_v46, %v80_v45  ;;  %v174_v49 = vpop.f32.mrb[5].mxu0 }
  0xe5   :  { %v175_v51 = vadd.f32 %v174_v49, %v70_v33  ;;  %v401_v52 = vpop.f32.mrb[6].mxu0  ;;  %402 = vmatprep.subr.bf16.mxu1 %v201_v47  ;;  %v340_v33 = vpop.permute.xlu0 %339 }
  0xe6   :  { %v186_v53 = vadd.f32 %v401_v52, %v85_v50  ;;  %v177_v54 = vpop.f32.mrb[7].mxu0  ;;  %403 = vmatpush3.bf16.msra.mxu1 %v201_v47  ;;  %v195_v56 = vmax.f32 %v183_v48, 0.0  ;;  %v345_v35 = vrot.slane %v340_v33, %v344_v31 }
  0xe7   :  { %v178_v55 = vadd.f32 %v177_v54, %v75_v38  ;;  %404 = vmatprep.subr.bf16.mxu1 %v202_v44  ;;  %v193_v58 = vmax.f32 %v175_v51, 0.0 }
  0xe8   :  { %v196_v57 = vmax.f32 %v186_v53, 0.0 }
  0xe9   :  { %v194_v59 = vmax.f32 %v178_v55, 0.0 }
  0xea   :  { %v204_v60 = vpack.c.bf16 %v196_v57, %v195_v56  ;;  %405 = vmatpush3.bf16.msra.mxu1 %v202_v44 }
  0xeb   :  { %v203_v61 = vpack.c.bf16 %v194_v59, %v193_v58 }
  0xed   :  { %406 = vmatprep.subr.bf16.mxu1 %v203_v61 }
  0xee   :  { %407 = vmatpush3.bf16.msra.mxu1 %v203_v61 }
  0xef   :  { %408 = vmatprep.subr.bf16.mxu1 %v204_v60 }
  0xf2   :  { %409 = vmatpush3.bf16.msra.mxu1 %v204_v60 }
  0xf5   :  { %411 = vmatmul.mubr.msk.bf16.vlgmr.msra.gmra.mrb[0].mxu1 %vm239_vm2, %v424_v62 }
 0x1c8   :  { %v412_v3 = vpop.f32.mrb[0].mxu1 }
 0x1c9   :  { %v280_v4 = vpop.f32.mrb[1].mxu1  ;;  %v289_v5 = vadd.f32 %v412_v3, %v222_v1 }
 0x1ca   :  { %v281_v6 = vadd.f32 %v280_v4, %v212_v63  ;;  %v413_v7 = vpop.f32.mrb[2].mxu1 }
 0x1cb   :  { %v283_v9 = vpop.f32.mrb[3].mxu1  ;;  %v292_v11 = vadd.f32 %v413_v7, %v227_v2  ;;  %v297_v14 = vmax.f32 %v289_v5, 0.0 }
 0x1cc   :  { %v295_v10 = vmax.f32 %v281_v6, 0.0  ;;  %v284_v12 = vadd.f32 %v283_v9, %v217_v0 }
 0x1cd   :  { %v298_v17 = vmax.f32 %v292_v11, 0.0  ;;  %v325_v20 = vmul.f32 %v316_v19, %v297_v14 }
 0x1ce   :  { %v296_v15 = vmax.f32 %v284_v12, 0.0  ;;  %v323_v16 = vmul.f32 %v306_v8, %v295_v10 }
 0x1cf   :  { %v326_v23 = vmul.f32 %v321_v22, %v298_v17 }
 0x1d0   :  { %v324_v18 = vmul.f32 %v311_v13, %v296_v15 }
 0x1d2   :  { %v327_v21 = vadd.f32 %v324_v18, %v323_v16 }
 0x1d4   :  { %v328_v24 = vadd.f32 %v327_v21, %v325_v20 }
 0x1d6   :  { %v329_v26 = vadd.f32 %v328_v24, %v326_v23 }
 0x1d8   :  { %v330_v27 = vrot.slane %v329_v26, 4 }
 0x1da   :  { %v331_v29 = vadd.f32 %v330_v27, %v329_v26 }
 0x1dc   :  { %v332_v30 = vrot.slane %v331_v29, 2 }
 0x1de   :  { %v333_v32 = vadd.f32 %v332_v30, %v331_v29 }
 0x1e0   :  { %v334_v34 = vrot.slane %v333_v32, 1 }
 0x1e2   :  { %v335_v36 = vadd.f32 %v334_v34, %v333_v32 }
 0x1e4   :  { %v346_v37 = vadd.f32 %v345_v35, %v335_v36 }
 0x1e6   :  { %v380_v38 = vmul.f32 -1.442695, %v346_v37 }
 0x1e8   :  { %425 = vpow2.f32 %v380_v38 }
 0x1f2   :  { %v426_v39 = vpop.eup %425 }
 0x1f3   :  { %v350_v40 = vadd.f32 1.0, %v426_v39 }
 0x1f5   :  { %427 = vrcp.f32 %v350_v40 }
 0x1ff   :  { %v428_v41 = vpop.eup %427 }
 0x200   :  { %353 = vst [vmem:[#allocation3] sm:$0x1] %v428_v41 }
 0x201   :  { %440 = shalt.err (!%p437_p4)
}
 0x202   :  { %s441_s23 = scalar_lea.hbm %s592_s7, 16 }
 0x203   :  { %p442_p5 = scmp.ne.s32.totalorder %s592_s7, %s441_s23  ;;  %p445_p6 = scmp.lt.u32.totalorder %s441_s23, %s592_s7 }
 0x205   :  { %p447_p7 = pnand %p445_p6, %p442_p5 }
 0x207   :  { %450 = shalt.err (!%p447_p7)
}
 0x208   :  { %363 = dma.vmem_to_hbm [thread:$0]  %s361_s18, 16, %s592_s7, [#allocation4]  }
 0x209   :  { %451 = dma.done.wait [#allocation4], 16  }
 0x20a   :  { %452 = vsyncadd [#allocation4], 4294967280 }
 0x20b   :  { %367 = vsyncpa [#allocation4], 1 }

</bundles_post_ra>
